<compile_context>
chip_gen: v7x
topology: tpu7x:2x2x1
jax: 0.10.0
libtpu: 0.0.40
codegen_flags: <defaults>
</compile_context>

<pallas_src>
import jax
import jax.numpy as jnp
import numpy as np
from jax.experimental import pallas as pl
from jax.experimental.pallas import tpu as pltpu


# ----------------------------- kernel ---------------------------------------


def make_kernel(P, H, Hh, NH):
    D1 = NH * Hh          # layer-1 concatenated head width
    D2 = NH * H           # layer-2 stacked head width (averaged)

    def kernel(x_ref, A_ref, mask_ref, wf1_ref, wf2_ref, wattn_ref,
               pooled_ref, attn_ref):
        f32 = jnp.float32
        x2 = x_ref[0]                      # (P, H)  one batch element per step
        allow = A_ref[0] > 0.0             # (P, P)  adjacency gate
        mask_c = mask_ref[0]               # (P, 1)  valid-post mask (column)

        def gat_layer(xin, wf_ref, dout, dh):
            # single fused matmul: [per-head features | src scores | dst scores]
            proj = jnp.dot(xin, wf_ref[...], preferred_element_type=f32)
            feat = proj[:, :dout]                          # (P, NH*dh)
            src = proj[:, dout:dout + NH]                  # (P, NH)
            dst = proj[:, dout + NH:dout + 2 * NH]         # (P, NH)
            # head-batched scores: e[h,q,k] = src[q,h] + dst[k,h]  (VPU add)
            src_t = jnp.transpose(src)                     # (NH, P)
            dst_t = jnp.transpose(dst)                     # (NH, P)
            e = src_t[:, :, None] + dst_t[:, None, :]      # (NH, P, P)
            e = jnp.where(e > 0.0, e, 0.2 * e)             # LeakyReLU(0.2)
            e = jnp.where(allow[None, :, :], e, -1e9)
            # one softmax pass for all heads
            e = e - jnp.max(e, axis=-1, keepdims=True)
            pe = jnp.exp(e)
            p = pe / jnp.sum(pe, axis=-1, keepdims=True)   # (NH, P, P)
            # per-head aggregation against that head's lane block only
            return [jnp.dot(p[h], feat[:, h * dh:(h + 1) * dh],
                            preferred_element_type=f32)
                    for h in range(NH)]                    # NH x (P, dh)

        # ---------------- BatchGAT encoder ----------------
        ctx1 = gat_layer(x2, wf1_ref, D1, Hh)
        h1 = jnp.concatenate(ctx1, axis=-1)                # (P, NH*Hh) concat
        h1 = jnp.where(h1 > 0.0, h1,
                       jnp.exp(jnp.minimum(h1, 0.0)) - 1.0)  # ELU (safe exp)
        ctx2 = gat_layer(h1, wf2_ref, D2, H)
        xc = ctx2[0]
        for h in range(1, NH):
            xc = xc + ctx2[h]
        xc = xc * (1.0 / NH)                               # (P, H) head average
        xc = xc * mask_c                                   # zero invalid posts

        # ---------------- Post_Attn ----------------
        root = mask_c * xc[0:1, :]                         # root feats, valid rows
        xr = jnp.concatenate([xc, root], axis=-1)          # (P, 2H)
        s = jnp.dot(xr, wattn_ref[...], preferred_element_type=f32)   # (P, 1)
        s = jnp.transpose(s)                               # (1, P) lane-dense
        s = jnp.where(s == 0.0, -1e20, s)                  # masked_fill_(attn==0)
        s = s - jnp.max(s, axis=-1, keepdims=True)
        es = jnp.exp(s)
        attn_row = es / jnp.sum(es, axis=-1, keepdims=True)            # (1, P)
        pooled = jnp.dot(attn_row, xc, preferred_element_type=f32)     # (1, H)

        pooled_ref[0] = pooled.astype(pooled_ref.dtype)
        attn_ref[0] = attn_row.astype(attn_ref.dtype)

    return kernel


# ----------------------------- wrapper ---------------------------------------


def _pack_layer(W, a_src, a_dst):
    """[W_cat | W.a_src | W.a_dst] -> (din, NH*dh + 2*NH) fused projection."""
    din = W.shape[1]
    wcat = jnp.transpose(W, (1, 0, 2)).reshape(din, -1)    # (din, NH*dh)
    ssrc = jnp.einsum('nio,no->in', W, a_src)              # (din, NH)
    sdst = jnp.einsum('nio,no->in', W, a_dst)              # (din, NH)
    return jnp.concatenate([wcat, ssrc, sdst], axis=1)


@jax.jit
def extractor_gat(params, x, A, mask_valid):
    NH, H, Hh = params["W1"].shape
    B, P, _ = x.shape
    f32 = jnp.float32

    # host-side packing (fused / cached by jit, outside the kernel)
    wf1 = _pack_layer(params["W1"], params["a1_src"], params["a1_dst"])
    wf2 = _pack_layer(params["W2"], params["a2_src"], params["a2_dst"])
    w_attn = params["w_attn"]                              # (2H, 1)
    mask3 = mask_valid.reshape(B, P, 1).astype(f32)

    def bspec(shape):          # batch-blocked 3-D array (one batch per step)
        return pl.BlockSpec((1,) + tuple(shape[1:]), lambda b: (b, 0, 0))

    def wspec(shape):          # VMEM-resident weight (same block every step)
        return pl.BlockSpec(tuple(shape), lambda b: (0, 0))

    fn = pl.pallas_call(
        make_kernel(P, H, Hh, NH),
        grid=(B,),                   # batch across grid steps (both TCs on v7x)
        in_specs=[bspec(x.shape), bspec(A.shape), bspec(mask3.shape),
                  wspec(wf1.shape), wspec(wf2.shape), wspec(w_attn.shape)],
        out_specs=(bspec((B, 1, H)), bspec((B, 1, P))),
        out_shape=(jax.ShapeDtypeStruct((B, 1, H), f32),
                   jax.ShapeDtypeStruct((B, 1, P), f32)),
        compiler_params=pltpu.CompilerParams(
            dimension_semantics=("parallel",)),
    )
    pooled3, attn3 = fn(x.astype(f32), A.astype(f32), mask3, wf1, wf2, w_attn)
    # lane-dense kernel outputs -> module's output shapes
    return pooled3.reshape(B, H), attn3.reshape(B, P, 1)


# -------------------------- deterministic params -----------------------------


def init_params(key, NH, H, Hh):
    ks = jax.random.split(key, 7)

    def w(k, shape, s):
        return jax.random.normal(k, shape, jnp.float32) * s

    return dict(
        W1=w(ks[0], (NH, H, Hh), 0.2),
        a1_src=w(ks[1], (NH, Hh), 0.5),
        a1_dst=w(ks[2], (NH, Hh), 0.5),
        W2=w(ks[3], (NH, NH * Hh, H), 0.2),
        a2_src=w(ks[4], (NH, H), 0.5),
        a2_dst=w(ks[5], (NH, H), 0.5),
        w_attn=w(ks[6], (2 * H, 1), 0.5),
    )


# ----------------------- pure-JAX reference (checking) -----------------------


def reference(params, x, A, mask_valid):
    NH, H, Hh = params["W1"].shape
    B, P, _ = x.shape
    A_ok = (A > 0.0)[:, None]                              # (B,1,P,P)

    def softmax_last(e):
        e = e - jnp.max(e, axis=-1, keepdims=True)
        p = jnp.exp(e)
        return p / jnp.sum(p, axis=-1, keepdims=True)

    def gat_layer(xin, W, a_s, a_d):
        h = jnp.einsum('bpi,nio->bnpo', xin, W)            # (B,NH,P,Dh)
        src = jnp.einsum('bnpo,no->bnp', h, a_s)
        dst = jnp.einsum('bnpo,no->bnp', h, a_d)
        e = src[:, :, :, None] + dst[:, :, None, :]
        e = jnp.where(e > 0.0, e, 0.2 * e)
        e = jnp.where(A_ok, e, -1e9)
        alpha = softmax_last(e)
        return jnp.einsum('bnij,bnjo->bnio', alpha, h)     # (B,NH,P,Dh)

    o1 = gat_layer(x, params["W1"], params["a1_src"], params["a1_dst"])
    o1 = jnp.transpose(o1, (0, 2, 1, 3)).reshape(B, P, NH * Hh)   # concat heads
    o1 = jnp.where(o1 > 0.0, o1, jnp.exp(o1) - 1.0)               # ELU
    o2 = gat_layer(o1, params["W2"], params["a2_src"], params["a2_dst"])
    xc = jnp.mean(o2, axis=1)                                     # head average
    xc = xc * mask_valid[:, :, None]

    root = mask_valid[:, :, None] * xc[:, 0:1, :]
    score = jnp.concatenate([xc, root], axis=-1) @ params["w_attn"]   # (B,P,1)
    score = jnp.where(score == 0.0, -1e20, score)
    score = score - jnp.max(score, axis=1, keepdims=True)
    pe = jnp.exp(score)
    attn = pe / jnp.sum(pe, axis=1, keepdims=True)
    pooled = jnp.einsum('bph,bpo->bh', xc, attn)
    return pooled, attn


# --------------------------------- main ---------------------------------------


if __name__ == "__main__":
    # n_head=4, h_in=32, h_hid=16, n_posts=8, batch=2
    NH, H, Hh, P, B = 4, 32, 16, 8, 2

    key = jax.random.PRNGKey(0)
    kx, ka, kp = jax.random.split(key, 3)
    x = jax.random.normal(kx, (B, P, H), jnp.float32)
    A = (jax.random.uniform(ka, (B, P, P)) > 0.4).astype(jnp.float32)
    A = jnp.maximum(A, jnp.eye(P, dtype=jnp.float32)[None])      # self loops
    mask_valid = jnp.ones((B, P), jnp.float32).at[1, P - 1].set(0.0)  # 1 invalid

    params = init_params(kp, NH, H, Hh)

    pooled, attn = extractor_gat(params, x, A, mask_valid)
    pooled, attn = jax.block_until_ready((pooled, attn))

    ref_pooled, ref_attn = reference(params, x, A, mask_valid)
    assert pooled.shape == (B, H) and attn.shape == (B, P, 1)
    np.testing.assert_allclose(np.asarray(pooled), np.asarray(ref_pooled),
                               rtol=2e-3, atol=2e-3)
    np.testing.assert_allclose(np.asarray(attn), np.asarray(ref_attn),
                               rtol=2e-3, atol=2e-3)

    print("KERNEL_OK")
</pallas_src>

<mosaic_0001>
module attributes {stable_mosaic.version = 11 : i64} {
  func.func @kernel(%arg0: i32, %arg1: memref<1x8x32xf32, #tpu.memory_space<vmem>>, %arg2: memref<1x8x8xf32, #tpu.memory_space<vmem>>, %arg3: memref<1x8x1xf32, #tpu.memory_space<vmem>>, %arg4: memref<32x72xf32, #tpu.memory_space<vmem>>, %arg5: memref<64x136xf32, #tpu.memory_space<vmem>>, %arg6: memref<64x1xf32, #tpu.memory_space<vmem>>, %arg7: memref<1x1x32xf32, #tpu.memory_space<vmem>>, %arg8: memref<1x1x8xf32, #tpu.memory_space<vmem>>) attributes {dimension_semantics = [#tpu.dimension_semantics<parallel>], iteration_bounds = array<i64: 2>, scalar_prefetch = 0 : i64, scratch_operands = 0 : i64, tpu.core_type = #tpu.core_type<tc>, window_params = [{transform_indices = @transform_0, window_bounds = array<i64: 1, 8, 32>}, {transform_indices = @transform_1, window_bounds = array<i64: 1, 8, 8>}, {transform_indices = @transform_2, window_bounds = array<i64: 1, 8, 1>}, {pipeline_mode = #tpu.pipeline_mode<synchronous>, transform_indices = @transform_3, window_bounds = array<i64: 32, 72>}, {pipeline_mode = #tpu.pipeline_mode<synchronous>, transform_indices = @transform_4, window_bounds = array<i64: 64, 136>}, {pipeline_mode = #tpu.pipeline_mode<synchronous>, transform_indices = @transform_5, window_bounds = array<i64: 64, 1>}, {transform_indices = @transform_6, window_bounds = array<i64: 1, 1, 32>}, {transform_indices = @transform_7, window_bounds = array<i64: 1, 1, 8>}]} {
    %c0 = arith.constant 0 : index
    %c0_0 = arith.constant 0 : index
    %c0_1 = arith.constant 0 : index
    %0 = vector.load %arg1[%c0, %c0_0, %c0_1] : memref<1x8x32xf32, #tpu.memory_space<vmem>>, vector<1x8x32xf32>
    %1 = vector.shape_cast %0 : vector<1x8x32xf32> to vector<8x32xf32>
    %c0_2 = arith.constant 0 : index
    %c0_3 = arith.constant 0 : index
    %c0_4 = arith.constant 0 : index
    %2 = vector.load %arg2[%c0_2, %c0_3, %c0_4] : memref<1x8x8xf32, #tpu.memory_space<vmem>>, vector<1x8x8xf32>
    %3 = vector.shape_cast %2 : vector<1x8x8xf32> to vector<8x8xf32>
    %cst = arith.constant 0.000000e+00 : f32
    %4 = vector.broadcast %cst : f32 to vector<8x8xf32>
    %5 = arith.cmpf ogt, %3, %4 : vector<8x8xf32>
    %c0_5 = arith.constant 0 : index
    %c0_6 = arith.constant 0 : index
    %c0_7 = arith.constant 0 : index
    %6 = vector.load %arg3[%c0_5, %c0_6, %c0_7] : memref<1x8x1xf32, #tpu.memory_space<vmem>>, vector<1x8x1xf32>
    %7 = vector.shape_cast %6 : vector<1x8x1xf32> to vector<8x1xf32>
    %c0_8 = arith.constant 0 : index
    %c0_9 = arith.constant 0 : index
    %8 = vector.load %arg4[%c0_8, %c0_9] : memref<32x72xf32, #tpu.memory_space<vmem>>, vector<32x72xf32>
    %cst_10 = arith.constant dense<0.000000e+00> : vector<8x72xf32>
    %9 = tpu.matmul %1, %8, %cst_10 {dimension_numbers = #tpu.dot_dimension_numbers<[1], [0], [0], [1], [0, 0, 1, 1], [], []>} : vector<8x32xf32>, vector<32x72xf32>, vector<8x72xf32> -> vector<8x72xf32>
    %10 = vector.extract_strided_slice %9 {offsets = [0, 0], sizes = [8, 64], strides = [1, 1]} : vector<8x72xf32> to vector<8x64xf32>
    %11 = vector.extract_strided_slice %9 {offsets = [0, 64], sizes = [8, 4], strides = [1, 1]} : vector<8x72xf32> to vector<8x4xf32>
    %12 = vector.extract_strided_slice %9 {offsets = [0, 68], sizes = [8, 4], strides = [1, 1]} : vector<8x72xf32> to vector<8x4xf32>
    %13 = tpu.transpose %11, [1, 0] : vector<8x4xf32> -> vector<4x8xf32>
    %14 = tpu.transpose %12, [1, 0] : vector<8x4xf32> -> vector<4x8xf32>
    %15 = vector.shape_cast %13 : vector<4x8xf32> to vector<4x8x1xf32>
    %16 = vector.shape_cast %14 : vector<4x8xf32> to vector<4x1x8xf32>
    %17 = vector.broadcast %15 : vector<4x8x1xf32> to vector<4x8x8xf32>
    %18 = vector.broadcast %16 : vector<4x1x8xf32> to vector<4x8x8xf32>
    %19 = arith.addf %17, %18 : vector<4x8x8xf32>
    %cst_11 = arith.constant 0.000000e+00 : f32
    %20 = vector.broadcast %cst_11 : f32 to vector<4x8x8xf32>
    %21 = arith.cmpf ogt, %19, %20 : vector<4x8x8xf32>
    %cst_12 = arith.constant 2.000000e-01 : f32
    %22 = vector.broadcast %cst_12 : f32 to vector<4x8x8xf32>
    %23 = arith.mulf %22, %19 : vector<4x8x8xf32>
    %24 = arith.select %21, %19, %23 : vector<4x8x8xi1>, vector<4x8x8xf32>
    %25 = vector.shape_cast %5 : vector<8x8xi1> to vector<1x8x8xi1>
    %cst_13 = arith.constant -1.000000e+09 : f32
    %26 = vector.shape_cast %25 : vector<1x8x8xi1> to vector<1x8x8xi1>
    %27 = vector.broadcast %26 : vector<1x8x8xi1> to vector<4x8x8xi1>
    %28 = vector.broadcast %cst_13 : f32 to vector<4x8x8xf32>
    %29 = arith.select %27, %24, %28 : vector<4x8x8xi1>, vector<4x8x8xf32>
    %cst_14 = arith.constant dense<0xFF800000> : vector<4x8xf32>
    %30 = vector.multi_reduction <maximumf>, %29, %cst_14 [2] : vector<4x8x8xf32> to vector<4x8xf32>
    %31 = vector.shape_cast %30 : vector<4x8xf32> to vector<4x8x1xf32>
    %32 = vector.broadcast %31 : vector<4x8x1xf32> to vector<4x8x8xf32>
    %33 = arith.subf %29, %32 : vector<4x8x8xf32>
    %34 = math.exp %33 : vector<4x8x8xf32>
    %cst_15 = arith.constant dense<0.000000e+00> : vector<4x8xf32>
    %35 = vector.multi_reduction <add>, %34, %cst_15 [2] : vector<4x8x8xf32> to vector<4x8xf32>
    %36 = vector.shape_cast %35 : vector<4x8xf32> to vector<4x8x1xf32>
    %37 = vector.broadcast %36 : vector<4x8x1xf32> to vector<4x8x8xf32>
    %38 = arith.divf %34, %37 : vector<4x8x8xf32>
    %39 = vector.extract_strided_slice %38 {offsets = [0, 0, 0], sizes = [1, 8, 8], strides = [1, 1, 1]} : vector<4x8x8xf32> to vector<1x8x8xf32>
    %40 = vector.shape_cast %39 : vector<1x8x8xf32> to vector<8x8xf32>
    %41 = vector.extract_strided_slice %10 {offsets = [0, 0], sizes = [8, 16], strides = [1, 1]} : vector<8x64xf32> to vector<8x16xf32>
    %cst_16 = arith.constant dense<0.000000e+00> : vector<8x16xf32>
    %42 = tpu.matmul %40, %41, %cst_16 {dimension_numbers = #tpu.dot_dimension_numbers<[1], [0], [0], [1], [0, 0, 1, 1], [], []>} : vector<8x8xf32>, vector<8x16xf32>, vector<8x16xf32> -> vector<8x16xf32>
    %43 = vector.extract_strided_slice %38 {offsets = [1, 0, 0], sizes = [1, 8, 8], strides = [1, 1, 1]} : vector<4x8x8xf32> to vector<1x8x8xf32>
    %44 = vector.shape_cast %43 : vector<1x8x8xf32> to vector<8x8xf32>
    %45 = vector.extract_strided_slice %10 {offsets = [0, 16], sizes = [8, 16], strides = [1, 1]} : vector<8x64xf32> to vector<8x16xf32>
    %cst_17 = arith.constant dense<0.000000e+00> : vector<8x16xf32>
    %46 = tpu.matmul %44, %45, %cst_17 {dimension_numbers = #tpu.dot_dimension_numbers<[1], [0], [0], [1], [0, 0, 1, 1], [], []>} : vector<8x8xf32>, vector<8x16xf32>, vector<8x16xf32> -> vector<8x16xf32>
    %47 = vector.extract_strided_slice %38 {offsets = [2, 0, 0], sizes = [1, 8, 8], strides = [1, 1, 1]} : vector<4x8x8xf32> to vector<1x8x8xf32>
    %48 = vector.shape_cast %47 : vector<1x8x8xf32> to vector<8x8xf32>
    %49 = vector.extract_strided_slice %10 {offsets = [0, 32], sizes = [8, 16], strides = [1, 1]} : vector<8x64xf32> to vector<8x16xf32>
    %cst_18 = arith.constant dense<0.000000e+00> : vector<8x16xf32>
    %50 = tpu.matmul %48, %49, %cst_18 {dimension_numbers = #tpu.dot_dimension_numbers<[1], [0], [0], [1], [0, 0, 1, 1], [], []>} : vector<8x8xf32>, vector<8x16xf32>, vector<8x16xf32> -> vector<8x16xf32>
    %51 = vector.extract_strided_slice %38 {offsets = [3, 0, 0], sizes = [1, 8, 8], strides = [1, 1, 1]} : vector<4x8x8xf32> to vector<1x8x8xf32>
    %52 = vector.shape_cast %51 : vector<1x8x8xf32> to vector<8x8xf32>
    %53 = vector.extract_strided_slice %10 {offsets = [0, 48], sizes = [8, 16], strides = [1, 1]} : vector<8x64xf32> to vector<8x16xf32>
    %cst_19 = arith.constant dense<0.000000e+00> : vector<8x16xf32>
    %54 = tpu.matmul %52, %53, %cst_19 {dimension_numbers = #tpu.dot_dimension_numbers<[1], [0], [0], [1], [0, 0, 1, 1], [], []>} : vector<8x8xf32>, vector<8x16xf32>, vector<8x16xf32> -> vector<8x16xf32>
    %55 = tpu.concatenate %42, %46, %50, %54 in 1 : vector<8x16xf32>, vector<8x16xf32>, vector<8x16xf32>, vector<8x16xf32> -> vector<8x64xf32>
    %cst_20 = arith.constant 0.000000e+00 : f32
    %56 = vector.broadcast %cst_20 : f32 to vector<8x64xf32>
    %57 = arith.cmpf ogt, %55, %56 : vector<8x64xf32>
    %cst_21 = arith.constant 0.000000e+00 : f32
    %58 = vector.broadcast %cst_21 : f32 to vector<8x64xf32>
    %59 = arith.minimumf %55, %58 : vector<8x64xf32>
    %60 = math.exp %59 : vector<8x64xf32>
    %cst_22 = arith.constant 1.000000e+00 : f32
    %61 = vector.broadcast %cst_22 : f32 to vector<8x64xf32>
    %62 = arith.subf %60, %61 : vector<8x64xf32>
    %63 = arith.select %57, %55, %62 : vector<8x64xi1>, vector<8x64xf32>
    %c0_23 = arith.constant 0 : index
    %c0_24 = arith.constant 0 : index
    %64 = vector.load %arg5[%c0_23, %c0_24] : memref<64x136xf32, #tpu.memory_space<vmem>>, vector<64x136xf32>
    %cst_25 = arith.constant dense<0.000000e+00> : vector<8x136xf32>
    %65 = tpu.matmul %63, %64, %cst_25 {dimension_numbers = #tpu.dot_dimension_numbers<[1], [0], [0], [1], [0, 0, 1, 1], [], []>} : vector<8x64xf32>, vector<64x136xf32>, vector<8x136xf32> -> vector<8x136xf32>
    %66 = vector.extract_strided_slice %65 {offsets = [0, 0], sizes = [8, 128], strides = [1, 1]} : vector<8x136xf32> to vector<8x128xf32>
    %67 = vector.extract_strided_slice %65 {offsets = [0, 128], sizes = [8, 4], strides = [1, 1]} : vector<8x136xf32> to vector<8x4xf32>
    %68 = vector.extract_strided_slice %65 {offsets = [0, 132], sizes = [8, 4], strides = [1, 1]} : vector<8x136xf32> to vector<8x4xf32>
    %69 = tpu.transpose %67, [1, 0] : vector<8x4xf32> -> vector<4x8xf32>
    %70 = tpu.transpose %68, [1, 0] : vector<8x4xf32> -> vector<4x8xf32>
    %71 = vector.shape_cast %69 : vector<4x8xf32> to vector<4x8x1xf32>
    %72 = vector.shape_cast %70 : vector<4x8xf32> to vector<4x1x8xf32>
    %73 = vector.broadcast %71 : vector<4x8x1xf32> to vector<4x8x8xf32>
    %74 = vector.broadcast %72 : vector<4x1x8xf32> to vector<4x8x8xf32>
    %75 = arith.addf %73, %74 : vector<4x8x8xf32>
    %cst_26 = arith.constant 0.000000e+00 : f32
    %76 = vector.broadcast %cst_26 : f32 to vector<4x8x8xf32>
    %77 = arith.cmpf ogt, %75, %76 : vector<4x8x8xf32>
    %cst_27 = arith.constant 2.000000e-01 : f32
    %78 = vector.broadcast %cst_27 : f32 to vector<4x8x8xf32>
    %79 = arith.mulf %78, %75 : vector<4x8x8xf32>
    %80 = arith.select %77, %75, %79 : vector<4x8x8xi1>, vector<4x8x8xf32>
    %81 = vector.shape_cast %5 : vector<8x8xi1> to vector<1x8x8xi1>
    %cst_28 = arith.constant -1.000000e+09 : f32
    %82 = vector.shape_cast %81 : vector<1x8x8xi1> to vector<1x8x8xi1>
    %83 = vector.broadcast %82 : vector<1x8x8xi1> to vector<4x8x8xi1>
    %84 = vector.broadcast %cst_28 : f32 to vector<4x8x8xf32>
    %85 = arith.select %83, %80, %84 : vector<4x8x8xi1>, vector<4x8x8xf32>
    %cst_29 = arith.constant dense<0xFF800000> : vector<4x8xf32>
    %86 = vector.multi_reduction <maximumf>, %85, %cst_29 [2] : vector<4x8x8xf32> to vector<4x8xf32>
    %87 = vector.shape_cast %86 : vector<4x8xf32> to vector<4x8x1xf32>
    %88 = vector.broadcast %87 : vector<4x8x1xf32> to vector<4x8x8xf32>
    %89 = arith.subf %85, %88 : vector<4x8x8xf32>
    %90 = math.exp %89 : vector<4x8x8xf32>
    %cst_30 = arith.constant dense<0.000000e+00> : vector<4x8xf32>
    %91 = vector.multi_reduction <add>, %90, %cst_30 [2] : vector<4x8x8xf32> to vector<4x8xf32>
    %92 = vector.shape_cast %91 : vector<4x8xf32> to vector<4x8x1xf32>
    %93 = vector.broadcast %92 : vector<4x8x1xf32> to vector<4x8x8xf32>
    %94 = arith.divf %90, %93 : vector<4x8x8xf32>
    %95 = vector.extract_strided_slice %94 {offsets = [0, 0, 0], sizes = [1, 8, 8], strides = [1, 1, 1]} : vector<4x8x8xf32> to vector<1x8x8xf32>
    %96 = vector.shape_cast %95 : vector<1x8x8xf32> to vector<8x8xf32>
    %97 = vector.extract_strided_slice %66 {offsets = [0, 0], sizes = [8, 32], strides = [1, 1]} : vector<8x128xf32> to vector<8x32xf32>
    %cst_31 = arith.constant dense<0.000000e+00> : vector<8x32xf32>
    %98 = tpu.matmul %96, %97, %cst_31 {dimension_numbers = #tpu.dot_dimension_numbers<[1], [0], [0], [1], [0, 0, 1, 1], [], []>} : vector<8x8xf32>, vector<8x32xf32>, vector<8x32xf32> -> vector<8x32xf32>
    %99 = vector.extract_strided_slice %94 {offsets = [1, 0, 0], sizes = [1, 8, 8], strides = [1, 1, 1]} : vector<4x8x8xf32> to vector<1x8x8xf32>
    %100 = vector.shape_cast %99 : vector<1x8x8xf32> to vector<8x8xf32>
    %101 = vector.extract_strided_slice %66 {offsets = [0, 32], sizes = [8, 32], strides = [1, 1]} : vector<8x128xf32> to vector<8x32xf32>
    %cst_32 = arith.constant dense<0.000000e+00> : vector<8x32xf32>
    %102 = tpu.matmul %100, %101, %cst_32 {dimension_numbers = #tpu.dot_dimension_numbers<[1], [0], [0], [1], [0, 0, 1, 1], [], []>} : vector<8x8xf32>, vector<8x32xf32>, vector<8x32xf32> -> vector<8x32xf32>
    %103 = vector.extract_strided_slice %94 {offsets = [2, 0, 0], sizes = [1, 8, 8], strides = [1, 1, 1]} : vector<4x8x8xf32> to vector<1x8x8xf32>
    %104 = vector.shape_cast %103 : vector<1x8x8xf32> to vector<8x8xf32>
    %105 = vector.extract_strided_slice %66 {offsets = [0, 64], sizes = [8, 32], strides = [1, 1]} : vector<8x128xf32> to vector<8x32xf32>
    %cst_33 = arith.constant dense<0.000000e+00> : vector<8x32xf32>
    %106 = tpu.matmul %104, %105, %cst_33 {dimension_numbers = #tpu.dot_dimension_numbers<[1], [0], [0], [1], [0, 0, 1, 1], [], []>} : vector<8x8xf32>, vector<8x32xf32>, vector<8x32xf32> -> vector<8x32xf32>
    %107 = vector.extract_strided_slice %94 {offsets = [3, 0, 0], sizes = [1, 8, 8], strides = [1, 1, 1]} : vector<4x8x8xf32> to vector<1x8x8xf32>
    %108 = vector.shape_cast %107 : vector<1x8x8xf32> to vector<8x8xf32>
    %109 = vector.extract_strided_slice %66 {offsets = [0, 96], sizes = [8, 32], strides = [1, 1]} : vector<8x128xf32> to vector<8x32xf32>
    %cst_34 = arith.constant dense<0.000000e+00> : vector<8x32xf32>
    %110 = tpu.matmul %108, %109, %cst_34 {dimension_numbers = #tpu.dot_dimension_numbers<[1], [0], [0], [1], [0, 0, 1, 1], [], []>} : vector<8x8xf32>, vector<8x32xf32>, vector<8x32xf32> -> vector<8x32xf32>
    %111 = arith.addf %98, %102 : vector<8x32xf32>
    %112 = arith.addf %111, %106 : vector<8x32xf32>
    %113 = arith.addf %112, %110 : vector<8x32xf32>
    %cst_35 = arith.constant 2.500000e-01 : f32
    %114 = vector.broadcast %cst_35 : f32 to vector<8x32xf32>
    %115 = arith.mulf %113, %114 : vector<8x32xf32>
    %116 = vector.broadcast %7 : vector<8x1xf32> to vector<8x32xf32>
    %117 = arith.mulf %115, %116 : vector<8x32xf32>
    %118 = vector.extract_strided_slice %117 {offsets = [0, 0], sizes = [1, 32], strides = [1, 1]} : vector<8x32xf32> to vector<1x32xf32>
    %119 = vector.broadcast %7 : vector<8x1xf32> to vector<8x32xf32>
    %120 = vector.broadcast %118 : vector<1x32xf32> to vector<8x32xf32>
    %121 = arith.mulf %119, %120 : vector<8x32xf32>
    %122 = tpu.concatenate %117, %121 in 1 : vector<8x32xf32>, vector<8x32xf32> -> vector<8x64xf32>
    %c0_36 = arith.constant 0 : index
    %c0_37 = arith.constant 0 : index
    %123 = vector.load %arg6[%c0_36, %c0_37] : memref<64x1xf32, #tpu.memory_space<vmem>>, vector<64x1xf32>
    %cst_38 = arith.constant dense<0.000000e+00> : vector<8x1xf32>
    %124 = tpu.matmul %122, %123, %cst_38 {dimension_numbers = #tpu.dot_dimension_numbers<[1], [0], [0], [1], [0, 0, 1, 1], [], []>} : vector<8x64xf32>, vector<64x1xf32>, vector<8x1xf32> -> vector<8x1xf32>
    %125 = tpu.transpose %124, [1, 0] : vector<8x1xf32> -> vector<1x8xf32>
    %cst_39 = arith.constant 0.000000e+00 : f32
    %126 = vector.broadcast %cst_39 : f32 to vector<1x8xf32>
    %127 = arith.cmpf oeq, %125, %126 : vector<1x8xf32>
    %cst_40 = arith.constant -1.000000e+20 : f32
    %128 = vector.broadcast %cst_40 : f32 to vector<1x8xf32>
    %129 = arith.select %127, %128, %125 : vector<1x8xi1>, vector<1x8xf32>
    %cst_41 = arith.constant dense<0xFF800000> : vector<1xf32>
    %130 = vector.multi_reduction <maximumf>, %129, %cst_41 [1] : vector<1x8xf32> to vector<1xf32>
    %131 = vector.shape_cast %130 : vector<1xf32> to vector<1x1xf32>
    %132 = vector.broadcast %131 : vector<1x1xf32> to vector<1x8xf32>
    %133 = arith.subf %129, %132 : vector<1x8xf32>
    %134 = math.exp %133 : vector<1x8xf32>
    %cst_42 = arith.constant dense<0.000000e+00> : vector<1xf32>
    %135 = vector.multi_reduction <add>, %134, %cst_42 [1] : vector<1x8xf32> to vector<1xf32>
    %136 = vector.shape_cast %135 : vector<1xf32> to vector<1x1xf32>
    %137 = vector.broadcast %136 : vector<1x1xf32> to vector<1x8xf32>
    %138 = arith.divf %134, %137 : vector<1x8xf32>
    %cst_43 = arith.constant dense<0.000000e+00> : vector<1x32xf32>
    %139 = tpu.matmul %138, %117, %cst_43 {dimension_numbers = #tpu.dot_dimension_numbers<[1], [0], [0], [1], [0, 0, 1, 1], [], []>} : vector<1x8xf32>, vector<8x32xf32>, vector<1x32xf32> -> vector<1x32xf32>
    %c0_44 = arith.constant 0 : index
    %c0_45 = arith.constant 0 : index
    %c0_46 = arith.constant 0 : index
    %140 = vector.load %arg7[%c0_44, %c0_45, %c0_46] : memref<1x1x32xf32, #tpu.memory_space<vmem>>, vector<1x1x32xf32>
    %141 = vector.shape_cast %140 : vector<1x1x32xf32> to vector<1x32xf32>
    %142 = vector.shape_cast %139 : vector<1x32xf32> to vector<1x1x32xf32>
    tpu.vector_store %arg7[%c0_44, %c0_45, %c0_46], %142 {strides = array<i32>} : memref<1x1x32xf32, #tpu.memory_space<vmem>>, vector<1x1x32xf32>,
    %c0_47 = arith.constant 0 : index
    %c0_48 = arith.constant 0 : index
    %c0_49 = arith.constant 0 : index
    %143 = vector.load %arg8[%c0_47, %c0_48, %c0_49] : memref<1x1x8xf32, #tpu.memory_space<vmem>>, vector<1x1x8xf32>
    %144 = vector.shape_cast %143 : vector<1x1x8xf32> to vector<1x8xf32>
    %145 = vector.shape_cast %138 : vector<1x8xf32> to vector<1x1x8xf32>
    tpu.vector_store %arg8[%c0_47, %c0_48, %c0_49], %145 {strides = array<i32>} : memref<1x1x8xf32, #tpu.memory_space<vmem>>, vector<1x1x8xf32>,
    return
  }
  func.func @transform_0(%arg0: i32) -> (i32, i32, i32) {
    %c0_i32 = arith.constant 0 : i32
    %c0_i32_0 = arith.constant 0 : i32
    %c0_i32_1 = arith.constant 0 : i32
    return %arg0, %c0_i32, %c0_i32_0 : i32, i32, i32
  }
  func.func @transform_1(%arg0: i32) -> (i32, i32, i32) {
    %c0_i32 = arith.constant 0 : i32
    %c0_i32_0 = arith.constant 0 : i32
    %c0_i32_1 = arith.constant 0 : i32
    return %arg0, %c0_i32, %c0_i32_0 : i32, i32, i32
  }
  func.func @transform_2(%arg0: i32) -> (i32, i32, i32) {
    %c0_i32 = arith.constant 0 : i32
    %c0_i32_0 = arith.constant 0 : i32
    %c0_i32_1 = arith.constant 0 : i32
    return %arg0, %c0_i32, %c0_i32_0 : i32, i32, i32
  }
  func.func @transform_3(%arg0: i32) -> (i32, i32) {
    %c0_i32 = arith.constant 0 : i32
    %c0_i32_0 = arith.constant 0 : i32
    %c0_i32_1 = arith.constant 0 : i32
    return %c0_i32, %c0_i32_0 : i32, i32
  }
  func.func @transform_4(%arg0: i32) -> (i32, i32) {
    %c0_i32 = arith.constant 0 : i32
    %c0_i32_0 = arith.constant 0 : i32
    %c0_i32_1 = arith.constant 0 : i32
    return %c0_i32, %c0_i32_0 : i32, i32
  }
  func.func @transform_5(%arg0: i32) -> (i32, i32) {
    %c0_i32 = arith.constant 0 : i32
    %c0_i32_0 = arith.constant 0 : i32
    %c0_i32_1 = arith.constant 0 : i32
    return %c0_i32, %c0_i32_0 : i32, i32
  }
  func.func @transform_6(%arg0: i32) -> (i32, i32, i32) {
    %c0_i32 = arith.constant 0 : i32
    %c0_i32_0 = arith.constant 0 : i32
    %c0_i32_1 = arith.constant 0 : i32
    return %arg0, %c0_i32, %c0_i32_0 : i32, i32, i32
  }
  func.func @transform_7(%arg0: i32) -> (i32, i32, i32) {
    %c0_i32 = arith.constant 0 : i32
    %c0_i32_0 = arith.constant 0 : i32
    %c0_i32_1 = arith.constant 0 : i32
    return %arg0, %c0_i32, %c0_i32_0 : i32, i32, i32
  }
}

</mosaic_0001>

<bundles_post_ra>
// kernel: extractor_gat.1
= control target key start
LH: loop header
LB: loop body
LE: loop exit
PB: predicated region body
PF: predicated region fallthrough
CT: control target
= control target key end

     0   :  { %13 = vsyncpa [#allocation3], 0  ;;  %s2689_s0 = inlined_call_operand.vmem [shape: f32[2,8,32], index: 0, kind: input, shape index: {}]   ;;  %s2690_s1 = inlined_call_operand.vmem [shape: f32[2,8,8], index: 1, kind: input, shape index: {}]   ;;  %s2691_s2 = inlined_call_operand.vmem [shape: f32[2,8,1], index: 2, kind: input, shape index: {}]   ;;  %s2692_s3 = inlined_call_operand.vmem [shape: f32[32,72], index: 3, kind: input, shape index: {}]   ;;  %s2693_s4 = inlined_call_operand.vmem [shape: f32[64,136], index: 4, kind: input, shape index: {}]   ;;  %s2694_s5 = inlined_call_operand.vmem [shape: f32[64,1], index: 5, kind: input, shape index: {}]   ;;  %s2695_s6 = inlined_call_operand.hbm [shape: f32[2,1,32], index: 6, kind: output, shape index: {0}]   ;;  %s2696_s7 = inlined_call_operand.hbm [shape: f32[2,1,8], index: 7, kind: output, shape index: {1}]  }
   0x1   :  { %15 = vsyncpa [#allocation3 + $0x1], 0 }
   0x2   :  { %16 = vsyncpa [#allocation5], 0 }
   0x3   :  { %18 = vsyncpa [#allocation5 + $0x1], 0  ;;  %s2311_s24 = smov 0   ;;  %s2313_s25 = smov 0  }
   0x4   :  { %s2315_s26 = smov 0   ;;  %s2317_s27 = smov 0  }
   0x5 LB: > { %s2332_s28 = sadd.s32 4294967295, %s2253_s27   ;;  %s1891_s29 = sadd.s32 4294967294, %s2253_s27   ;;  %s2253_s27 = sphi %s2317_s27, %s2702_s27   ;;  %s2249_s26 = sphi %s2315_s26, %s2701_s26   ;;  %s2245_s25 = sphi %s2313_s25, %s2700_s25   ;;  %s2241_s24 = sphi %s2311_s24, %s2699_s24  }
   0x6   : > { %s2336_s30 = sadd.s32 1, %s2253_s27   ;;  %s172_s8 = sadd.s32 1, %s2249_s26 }
   0x7   : > { %s169_s9 = ssub.s32 %s2253_s27, %s2336_s30  ;;  %p182_p0 = scmp.ne.s32.totalorder %s2249_s26, %s2245_s25 }
   0x8   : > { %p170_p1 = scmp.eq.s32.totalorder %s169_s9, 0  ;;  %p183_p2 = scmp.eq.s32.totalorder %s2332_s28, 1 }
   0x9   : > { %p188_p3 = scmp.ne.s32.totalorder %s2245_s25, %s2241_s24  ;;  %p189_p4 = scmp.eq.s32.totalorder %s1891_s29, 1 }
   0xa   : > { %s2347_s10 = scalar_select %p170_p1, %s2249_s26, %s172_s8  }
   0xb   : > { %p2349_p5 = por %p183_p2, %p182_p0  ;;  %p2353_p6 = por %p189_p4, %p188_p3 }
   0xc   : > { %p1894_p7 = scmp.ge.s32.totalorder %s2253_s27, 1  ;;  %p263_p8 = scmp.lt.s32.totalorder %s2253_s27, 3 }
   0xe   : > { %p264_p9 = pnand %p1894_p7, %p263_p8 }
   0xf   : > { %v321_v0 = vld [vmem:[%s2692_s3] sm:$0xff] (!%p264_p9)  ;;  %v322_v1 = vld [vmem:[%s2692_s3 + $0x8] sm:$0xff] (!%p264_p9)  ;;  %v323_v2 = vld [vmem:[%s2692_s3 + $0x10] sm:$0xff] (!%p264_p9)  ;;  %v2255_v3 = vmov (!%p264_p9), 0.0|0.0   ;;  %vm2256_vm0 = vmmov (!%p264_p9), 0   ;;  %v2257_v6 = vmov (!%p264_p9), 0.0   ;;  %v470_v12 = vlaneseq (!%p264_p9) }
  0x10   : > { %267 = sbr.rel (%p264_p9) target bundleno = 3436 (0xd6c), region = 44  ;;  %2022 = vmatprep.subr.bf16.mxu0 (!%p264_p9), %v2255_v3  ;;  %v2023_v4 = vpack.c.bf16 (!%p264_p9), %v322_v1, %v321_v0  ;;  %v324_v5 = vld [vmem:[%s2692_s3 + $0x18] sm:$0xff] (!%p264_p9)  ;;  %1955 = vmatprep.mubr.msk.f32.mxu0 (!%p264_p9), %vm2256_vm0, %v2257_v6  ;;  %p305_p10 = scmp.lt.s32.totalorder (!%p264_p9), %s2332_s28, 1  ;;  %vm325_vm1 = vcmask (!%p264_p9), 261120   ;;  %v2260_v25 = vmov (!%p264_p9), 1966171168  }
  0x11   : > { %1963 = vmatprep.subr.mxu1 (!%p264_p9), %v2257_v6  ;;  %1965 = vmatprep.mubr.msk.f32.mxu1 (!%p264_p9), %vm2256_vm0, %v2257_v6  ;;  %v2026_v7 = vpack.c.bf16 (!%p264_p9), %v324_v5, %v323_v2  ;;  %s2258_s9 = smov (!%p264_p9), 64   ;;  %s2259_s13 = smov (!%p264_p9), 60   ;;  %v2397_v13 = vshrl.u32 (!%p264_p9), %v470_v12, 7  ;;  %v500_v26 = vunpack.c.l.s4 (!%p264_p9), %v2260_v25  ;;  %vm565_vm4 = vcmask (!%p264_p9), 64512  }
  0x12   : > { %2024 = vmatpush3.bf16.msra.mxu0 (!%p264_p9), %v2023_v4  ;;  %s2261_s17 = smov (!%p264_p9), 96   ;;  %s2262_s18 = smov (!%p264_p9), 112   ;;  %vm923_vm8 = vcmask (!%p264_p9), 130048   ;;  %vm926_vm9 = vcmask (!%p264_p9), 392192   ;;  %vm950_vm10 = vcmask (!%p264_p9), 523264  }
  0x13   : > { %2025 = vmatprep.subr.bf16.mxu0 (!%p264_p9), %v2255_v3  ;;  %v2400_v14 = vsub.s32 (!%p264_p9), 0, %v2397_v13  ;;  %v479_v15 = vsub.s32 (!%p264_p9), 1, %v2397_v13  ;;  %v486_v19 = vsub.s32 (!%p264_p9), 2, %v2397_v13  ;;  %v493_v21 = vsub.s32 (!%p264_p9), 3, %v2397_v13  ;;  %s2263_s19 = smov (!%p264_p9), 80   ;;  %s2264_s20 = smov (!%p264_p9), 16  }
  0x14   : > { %v501_v28 = vunpack.c.0.s8 (!%p264_p9), %v500_v26  ;;  %s2265_s14 = smov (!%p264_p9), 32   ;;  %s2267_s29 = smov (!%p264_p9), 124  }
  0x16   : > { %2027 = vmatpush3.bf16.msra.mxu0 (!%p264_p9), %v2026_v7  ;;  %v2413_v30 = vsub.s32 (!%p264_p9), %v501_v28, %v2397_v13 }
  0x17   : > { %s306_s21 = scalar_select %p305_p10, %s2332_s28, 1  ;;  %1958 = vmatprep.subr.mxu0 %v2257_v6 }
  0x19   : > { %s2380_s22 = sshll.u32 %s306_s21, 3 }
  0x1a   : > { %s308_s8 = scalar_lea.vmem %s2689_s0, %s2380_s22  ;;  %s312_s16 = scalar_lea.vmem %s2690_s1, %s2380_s22 }
  0x1b   : > { %v317_v8 = vld [vmem:[%s308_s8] sm:$0xff]  ;;  %s2266_s8 = smov 48   ;;  %s316_s15 = scalar_lea.vmem %s2691_s2, %s2380_s22 }
  0x1c   : > { %1956 = vmatmul.mubr.msk.f32.vlgmr.msra.gmra.mrb[0].mxu0 %vm325_vm1, %v317_v8  ;;  %v2421_v35 = vld [vmem:[%s312_s16] sm:$0xff] }
  0x1d   : > { %1960 = vmatprep.mubr.msk.f32.mxu0 %vm2256_vm0, %v2257_v6  ;;  %vm319_vm2 = vcmp.gt.f32.partialorder %v2421_v35, 0.0 }
  0xef   : > { %v2390_v9 = vpop.f32.mrb[0].mxu0 }
  0xf0   : > { %400 = vrot.lane.b32.xlu0 %v2390_v9, %s2258_s9  ;;  %v1957_v10 = vpop.f32.mrb[1].mxu0  ;;  %1959 = vmatpush3.msra.mxu0 %v2390_v9 }
  0xf1   : > { %1973 = vmatprep.subr.mxu0 %v2257_v6 }
  0xf4   : > { %435 = vrot.lane.b32.xlu0 %v2390_v9, %s2259_s13  ;;  %s2269_s13 = smov [#allocation4]  }
 0x162   : > { %v401_v11 = vpop.permute.xlu0 %400 }
 0x163   : > { %403 = vxpose.xlu1.b32.start.end [1/1] (short) (narrow) %v401_v11, 8 }
 0x166   : > { %v436_v23 = vpop.permute.xlu0 %435 }
 0x1e3   : > { %v419_v16 = vpop.trf.xlu1 }
 0x1e4   : > { %v480_v17 = vrot.slane %v419_v16, %v479_v15  ;;  %v473_v18 = vrot.slane %v419_v16, %v2400_v14  ;;  %v487_v20 = vrot.slane %v419_v16, %v486_v19  ;;  %v494_v22 = vrot.slane %v419_v16, %v493_v21 }
 0x1e6   : > { %482 = vbcast.lane.b32.xlu1 %v480_v17, 256  ;;  %475 = vbcast.lane.b32.xlu0 %v473_v18, 256 }
 0x1ea   : > { %489 = vbcast.lane.b32.xlu0 %v487_v20, 256 }
 0x1ee   : > { %496 = vbcast.lane.b32.xlu0 %v494_v22, 256 }
 0x20c   : > { %438 = vxpose.xlu0.b32.start.end [1/1] (short) (narrow) %v436_v23, 8 }
 0x258   : > { %v476_v24 = vpop.permute.xlu0 %475  ;;  %v483_v43 = vpop.permute.xlu1 %482 }
 0x25c   : > { %v490_v27 = vpop.permute.xlu0 %489 }
 0x260   : > { %v497_v29 = vpop.permute.xlu0 %496 }
 0x28c   : > { %v454_v31 = vpop.trf.xlu0 }
 0x28d   : > { %v505_v32 = vrot.slane %v454_v31, %v2413_v30 }
 0x28f   : > { %v506_v33 = vcombine.high %v505_v32, %v505_v32  ;;  %v513_v34 = vrot.slane %v505_v32, %v2413_v30 }
 0x291   : > { %v520_v36 = vrot.slane %v506_v33, %v2413_v30  ;;  %v521_v37 = vcombine.high %v513_v34, %v513_v34  ;;  %v526_v38 = vrot.slane %v513_v34, %v2400_v14 }
 0x293   : > { %v522_v39 = vcombine.high %v520_v36, %v520_v36  ;;  %v530_v40 = vrot.slane %v520_v36, %v2400_v14  ;;  %v534_v41 = vrot.slane %v521_v37, %v2400_v14  ;;  %v543_v42 = vadd.f32 %v526_v38, %v476_v24 }
 0x295   : > { %v538_v44 = vrot.slane %v522_v39, %v2400_v14  ;;  %vm547_vm3 = vcmp.gt.f32.partialorder %v543_v42, 0.0  ;;  %v551_v45 = vmul.f32 0.2, %v543_v42  ;;  %v544_v46 = vadd.f32 %v530_v40, %v483_v43 }
 0x296   : > { %v545_v47 = vadd.f32 %v534_v41, %v490_v27 }
 0x297   : > { %v555_v48 = vsel %vm547_vm3, %v543_v42, %v551_v45  ;;  %vm548_vm5 = vcmp.gt.f32.partialorder %v544_v46, 0.0  ;;  %v552_v49 = vmul.f32 0.2, %v544_v46  ;;  %v546_v50 = vadd.f32 %v538_v44, %v497_v29 }
 0x298   : > { %v561_v51 = vsel %vm319_vm2, %v555_v48, -1e+09  ;;  %vm549_vm6 = vcmp.gt.f32.partialorder %v545_v47, 0.0  ;;  %v553_v52 = vmul.f32 0.2, %v545_v47 }
 0x299   : > { %v566_v53 = vsel %vm565_vm4, %v561_v51, -inf  ;;  %v556_v54 = vsel %vm548_vm5, %v544_v46, %v552_v49  ;;  %v554_v55 = vmul.f32 0.2, %v546_v50  ;;  %vm550_vm7 = vcmp.gt.f32.partialorder %v546_v50, 0.0  ;;  %v935_v46 = vld [vmem:[%s2693_s4 + $0x8] sm:$0xff]  ;;  %v934_v49 = vld [vmem:[%s2693_s4] sm:$0xff] }
 0x29a   : > { %567 = vmax.xlane.f32.xlu0 %v566_v53  ;;  %v562_v56 = vsel %vm319_vm2, %v556_v54, -1e+09  ;;  %v557_v57 = vsel %vm549_vm6, %v545_v47, %v553_v52  ;;  %v937_v47 = vld [vmem:[%s2693_s4 + $0x18] sm:$0xff]  ;;  %v939_v54 = vld [vmem:[%s2693_s4 + $0x28] sm:$0xff] }
 0x29b   : > { %v569_v58 = vsel %vm565_vm4, %v562_v56, -inf  ;;  %v563_v59 = vsel %vm319_vm2, %v557_v57, -1e+09  ;;  %v558_v60 = vsel %vm550_vm7, %v546_v50, %v554_v55  ;;  %v2028_v48 = vpack.c.bf16 %v937_v47, %v935_v46  ;;  %v936_v50 = vld [vmem:[%s2693_s4 + $0x10] sm:$0xff]  ;;  %v941_v55 = vld [vmem:[%s2693_s4 + $0x38] sm:$0xff]  ;;  %v938_v57 = vld [vmem:[%s2693_s4 + $0x20] sm:$0xff] }
 0x29c   : > { %570 = vmax.xlane.f32.xlu1 %v569_v58  ;;  %v572_v61 = vsel %vm565_vm4, %v563_v59, -inf  ;;  %v564_v62 = vsel %vm319_vm2, %v558_v60, -1e+09  ;;  %v940_v58 = vld [vmem:[%s2693_s4 + $0x30] sm:$0xff] }
 0x29d   : > { %v575_v63 = vsel %vm565_vm4, %v564_v62, -inf }
 0x2a0   : > { %573 = vmax.xlane.f32.xlu1 %v572_v61 }
 0x2a4   : > { %576 = vmax.xlane.f32.xlu1 %v575_v63  ;;  %v945_v63 = vld [vmem:[%s2693_s4 + $0x58] sm:$0xff] }
 0x2b0   : > { %759 = vrot.lane.b32.xlu0 %v2390_v9, %s2261_s17 }
 0x2b5   : > { %683 = vrot.lane.b32.xlu1 %v2390_v9, %s2262_s18  ;;  %s1911_s18 = sshll.u32 %s2332_s28, 4 }
 0x2b6   : > { %s2620_s21 = scalar_lea.hbm %s2696_s7, %s1911_s18 }
 0x327   : > { %v568_v0 = vpop.xlane.xlu0 %567 }
 0x328   : > { %v578_v1 = vsub.f32 %v561_v51, %v568_v0  ;;  %v2030_v51 = vpack.c.bf16 %v936_v50, %v934_v49 }
 0x329   : > { %v571_v2 = vpop.xlane.xlu1 %570 }
 0x32a   : > { %v579_v4 = vsub.f32 %v562_v56, %v571_v2  ;;  %v582_v5 = vmul.f32 1.442695, %v578_v1  ;;  %v2032_v56 = vpack.c.bf16 %v941_v55, %v939_v54  ;;  %v942_v1 = vld [vmem:[%s2693_s4 + $0x40] sm:$0xff]  ;;  %v944_v2 = vld [vmem:[%s2693_s4 + $0x50] sm:$0xff] }
 0x32b   : > { %v760_v37 = vpop.permute.xlu0 %759 }
 0x32c   : > { %v584_v7 = vmul.f32 1.442695, %v579_v4  ;;  %v2038_v4 = vpack.c.bf16 %v944_v2, %v942_v1 }
 0x32d   : > { %v574_v8 = vpop.xlane.xlu1 %573 }
 0x32e   : > { %2121 = vpow2.f32 %v584_v7  ;;  %v580_v10 = vsub.f32 %v563_v59, %v574_v8  ;;  %v2034_v59 = vpack.c.bf16 %v940_v58, %v938_v57  ;;  %v947_v8 = vld [vmem:[%s2693_s4 + $0x68] sm:$0xff] }
 0x32f   : > { %2123 = vpow2.f32 %v582_v5 }
 0x330   : > { %v586_v11 = vmul.f32 1.442695, %v580_v10  ;;  %v949_v10 = vld [vmem:[%s2693_s4 + $0x78] sm:$0xff] }
 0x331   : > { %v577_v12 = vpop.xlane.xlu1 %576 }
 0x332   : > { %v581_v16 = vsub.f32 %v564_v62, %v577_v12  ;;  %2125 = vpow2.f32 %v586_v11  ;;  %v943_v62 = vld [vmem:[%s2693_s4 + $0x48] sm:$0xff]  ;;  %v2040_v11 = vpack.c.bf16 %v949_v10, %v947_v8  ;;  %v946_v12 = vld [vmem:[%s2693_s4 + $0x60] sm:$0xff] }
 0x333   : > { %v2036_v0 = vpack.c.bf16 %v945_v63, %v943_v62 }
 0x334   : > { %v588_v17 = vmul.f32 1.442695, %v581_v16  ;;  %v948_v16 = vld [vmem:[%s2693_s4 + $0x70] sm:$0xff] }
 0x335   : > { %v684_v18 = vpop.permute.xlu1 %683 }
 0x336   : > { %1964 = vmatpush3.msra.mxu1 %v684_v18  ;;  %2127 = vpow2.f32 %v588_v17  ;;  %v2042_v17 = vpack.c.bf16 %v948_v16, %v946_v12 }
 0x337   : > { %1968 = vmatprep.subr.mxu1 %v2257_v6 }
 0x338   : > { %v2122_v20 = vpop.eup %2121 }
 0x339   : > { %v593_v22 = vsel %vm565_vm4, %v2122_v20, 0.0  ;;  %v2124_v23 = vpop.eup %2123 }
 0x33a   : > { %594 = vadd.xlane.f32.xlu1 %v593_v22  ;;  %v590_v24 = vsel %vm565_vm4, %v2124_v23, 0.0 }
 0x33c   : > { %v2126_v25 = vpop.eup %2125 }
 0x33d   : > { %v596_v26 = vsel %vm565_vm4, %v2126_v25, 0.0 }
 0x33e   : > { %591 = vadd.xlane.f32.xlu1 %v590_v24 }
 0x340   : > { %v2128_v27 = vpop.eup %2127 }
 0x341   : > { %v599_v28 = vsel %vm565_vm4, %v2128_v27, 0.0 }
 0x342   : > { %597 = vadd.xlane.f32.xlu1 %v596_v26 }
 0x346   : > { %600 = vadd.xlane.f32.xlu1 %v599_v28 }
 0x357   : > { %835 = vrot.lane.b32.xlu1 %v2390_v9, %s2263_s19 }
 0x3c7   : > { %v595_v29 = vpop.xlane.xlu1 %594 }
 0x3c8   : > { %2129 = vrcp.f32 %v595_v29 }
 0x3cb   : > { %v592_v31 = vpop.xlane.xlu1 %591 }
 0x3cc   : > { %2131 = vrcp.f32 %v592_v31 }
 0x3cf   : > { %v598_v32 = vpop.xlane.xlu1 %597 }
 0x3d0   : > { %2133 = vrcp.f32 %v598_v32 }
 0x3d2   : > { %v2130_v33 = vpop.eup %2129 }
 0x3d3   : > { %v601_v34 = vpop.xlane.xlu1 %600  ;;  %v605_v36 = vmul.f32 %v2130_v33, %v2122_v20 }
 0x3d4   : > { %2135 = vrcp.f32 %v601_v34 }
 0x3d5   : > { %1966 = vmatmul.mubr.msk.f32.vlgmr.msra.gmra.mrb[0].mxu1 %vm565_vm4, %v605_v36 }
 0x3d6   : > { %v2132_v38 = vpop.eup %2131  ;;  %1969 = vmatpush3.msra.mxu1 %v760_v37  ;;  %1970 = vmatprep.mubr.msk.f32.mxu1 %vm2256_vm0, %v2257_v6 }
 0x3d7   : > { %v603_v39 = vmul.f32 %v2132_v38, %v2124_v23  ;;  %v836_v9 = vpop.permute.xlu1 %835  ;;  %2029 = vmatprep.subr.bf16.mxu1 %v2028_v48 }
 0x3d9   : > { %1961 = vmatmul.mubr.msk.f32.vlgmr.msra.gmra.mrb[2].mxu0 %vm565_vm4, %v603_v39 }
 0x3da   : > { %v2134_v40 = vpop.eup %2133  ;;  %1974 = vmatpush3.msra.mxu0 %v836_v9  ;;  %1975 = vmatprep.mubr.msk.f32.mxu0 %vm2256_vm0, %v2257_v6 }
 0x3db   : > { %v607_v41 = vmul.f32 %v2134_v40, %v2126_v25  ;;  %1978 = vmatprep.subr.mxu0 %v2257_v6 }
 0x3dd   : > { %1971 = vmatmul.mubr.msk.f32.vlgmr.msra.gmra.mrb[2].mxu1 %vm565_vm4, %v607_v41 }
 0x3de   : > { %v2136_v42 = vpop.eup %2135  ;;  %1018 = vmatprep.mubr.f32.mxu1 %v2257_v6  ;;  %2031 = vmatpush1.bf16.msra.mxu1 %v2030_v51 }
 0x3df   : > { %v609_v43 = vmul.f32 %v2136_v42, %v2128_v27  ;;  %2033 = vmatprep.subr.bf16.mxu1 %v2032_v56 }
 0x3e1   : > { %1976 = vmatmul.mubr.msk.f32.vlgmr.msra.gmra.mrb[4].mxu0 %vm565_vm4, %v609_v43 }
 0x3e2   : > { %1980 = vmatprep.mubr.msk.f32.mxu0 %vm2256_vm0, %v2257_v6  ;;  %2035 = vmatpush1.bf16.msra.mxu1 %v2034_v59 }
 0x3e3   : > { %2037 = vmatprep.subr.bf16.mxu1 %v2036_v0 }
 0x3e6   : > { %2039 = vmatpush1.bf16.msra.mxu1 %v2038_v4 }
 0x3e7   : > { %2041 = vmatprep.subr.bf16.mxu1 %v2040_v11 }
 0x3ea   : > { %2043 = vmatpush1.bf16.msra.mxu1 %v2042_v17 }
 0x3eb   : > { %2044 = vmatprep.subr.bf16.mxu1 %v2255_v3 }
 0x4a8   : > { %v755_v44 = vpop.f32.mrb[0].mxu1 }
 0x4a9   : > { %912 = vrot.lane.b32.xlu1 %v755_v44, %s2264_s20  ;;  %v1967_v45 = vpop.f32.mrb[1].mxu1 }
 0x4ac   : > { %v679_v52 = vpop.f32.mrb[2].mxu0 }
 0x4ad   : > { %v1962_v53 = vpop.f32.mrb[3].mxu0 }
 0x4b0   : > { %v831_v60 = vpop.f32.mrb[2].mxu1 }
 0x4b1   : > { %916 = vrot.lane.b32.xlu0 %v831_v60, %s2265_s14  ;;  %v1972_v61 = vpop.f32.mrb[3].mxu1 }
 0x4b4   : > { %v907_v5 = vpop.f32.mrb[4].mxu0 }
 0x4b5   : > { %920 = vrot.lane.b32.xlu1 %v907_v5, %s2266_s8  ;;  %v1977_v7 = vpop.f32.mrb[5].mxu0 }
 0x51b   : > { %v913_v18 = vpop.permute.xlu1 %912 }
 0x51c   : > { %v924_v22 = vsel %vm923_vm8, %v679_v52, %v913_v18 }
 0x523   : > { %v917_v20 = vpop.permute.xlu0 %916 }
 0x524   : > { %v925_v23 = vsel %vm325_vm1, %v924_v22, %v917_v20 }
 0x527   : > { %v921_v24 = vpop.permute.xlu1 %920 }
 0x528   : > { %v927_v25 = vsel %vm926_vm9, %v925_v23, %v921_v24 }
 0x529   : > { %v929_v26 = vmin.f32 %v927_v25, 0.0  ;;  %vm928_vm11 = vcmp.gt.f32.partialorder %v927_v25, 0.0 }
 0x52b   : > { %v930_v27 = vmul.f32 1.442695, %v929_v26 }
 0x52d   : > { %2137 = vpow2.f32 %v930_v27 }
 0x537   : > { %v2138_v28 = vpop.eup %2137 }
 0x538   : > { %v1903_v29 = vadd.f32 -1.0, %v2138_v28 }
 0x53a   : > { %v933_v31 = vsel %vm928_vm11, %v927_v25, %v1903_v29 }
 0x53b   : > { %1904 = vmatmul.mubr.msk.f32.vlgmr.msra.gmra.mrb[4].mxu1 %vm950_vm10, %v933_v31 }
 0x53c   : > { %2014 = vmatprep.mubr.msk.f32.mxu1 %vm2256_vm0, %v2257_v6 }
 0x60e   : > { %v2516_v32 = vpop.f32.mrb[4].mxu1 }
 0x60f   : > { %v1022_v33 = vpop.f32.mrb[5].mxu1 }
 0x610   : > { %1025 = vxpose.xlu1.b32.start.end [1/1] (short) (narrow) %v1022_v33, 8  ;;  %1058 = vrot.lane.b32.xlu0 %v1022_v33, %s2267_s29 }
 0x682   : > { %v1059_v39 = vpop.permute.xlu0 %1058 }
 0x690   : > { %v1041_v34 = vpop.trf.xlu1 }
 0x691   : > { %v1096_v36 = vrot.slane %v1041_v34, %v2400_v14  ;;  %v1103_v37 = vrot.slane %v1041_v34, %v479_v15  ;;  %v1110_v38 = vrot.slane %v1041_v34, %v486_v19  ;;  %v1117_v9 = vrot.slane %v1041_v34, %v493_v21 }
 0x693   : > { %1098 = vbcast.lane.b32.xlu1 %v1096_v36, 256  ;;  %1105 = vbcast.lane.b32.xlu0 %v1103_v37, 256  ;;  %v2268_v36 = vmov 0   ;;  %v320_v37 = vld [vmem:[%s316_s15] sm:$0xff]  ;;  %s2163_s15 = sshll.u32 %s2269_s13, 4  ;;  %s2164_s15 = int_to_ptr.vmem [resolvable:$false] %s2163_s15 }
 0x694   : > { %s2165_s22 = scalar_lea.vmem %s2164_s15, 32 }
 0x697   : > { %1112 = vbcast.lane.b32.xlu0 %v1110_v38, 256 }
 0x6b5   : > { %1061 = vxpose.xlu0.b32.start.end [1/1] (short) (narrow) %v1059_v39, 8 }
 0x6de   : > { %1119 = vbcast.lane.b32.xlu0 %v1117_v9, 256 }
 0x6df   : > { %2120 = vset.pattern.permute.xlu0 %v2268_v36 }
 0x705   : > { %v1106_v40 = vpop.permute.xlu0 %1105  ;;  %v1099_v57 = vpop.permute.xlu1 %1098 }
 0x709   : > { %v1113_v41 = vpop.permute.xlu0 %1112 }
 0x735   : > { %v1077_v42 = vpop.trf.xlu0 }
 0x736   : > { %v1128_v43 = vrot.slane %v1077_v42, %v2413_v30 }
 0x738   : > { %v1129_v44 = vcombine.high %v1128_v43, %v1128_v43  ;;  %v1136_v15 = vrot.slane %v1128_v43, %v2413_v30 }
 0x73a   : > { %v1143_v45 = vrot.slane %v1129_v44, %v2413_v30  ;;  %v1144_v46 = vcombine.high %v1136_v15, %v1136_v15  ;;  %v1149_v55 = vrot.slane %v1136_v15, %v2400_v14 }
 0x73c   : > { %v1153_v19 = vrot.slane %v1143_v45, %v2400_v14  ;;  %v1157_v47 = vrot.slane %v1144_v46, %v2400_v14  ;;  %v1145_v56 = vcombine.high %v1143_v45, %v1143_v45  ;;  %v1166_v58 = vadd.f32 %v1149_v55, %v1099_v57  ;;  %v1558_v55 = vld [vmem:[%s2694_s5 + $0x38] sm:$0xff] }
 0x73e   : > { %v1168_v48 = vadd.f32 %v1157_v47, %v1113_v41  ;;  %v1167_v49 = vadd.f32 %v1153_v19, %v1106_v40  ;;  %v1161_v59 = vrot.slane %v1145_v56, %v2400_v14  ;;  %v1174_v62 = vmul.f32 0.2, %v1166_v58 }
 0x73f   : > { %vm1170_vm14 = vcmp.gt.f32.partialorder %v1166_v58, 0.0 }
 0x740   : > { %vm1172_vm12 = vcmp.gt.f32.partialorder %v1168_v48, 0.0  ;;  %v1176_v13 = vmul.f32 0.2, %v1168_v48  ;;  %vm1171_vm13 = vcmp.gt.f32.partialorder %v1167_v49, 0.0  ;;  %v1175_v21 = vmul.f32 0.2, %v1167_v49 }
 0x741   : > { %v1178_v1 = vsel %vm1170_vm14, %v1166_v58, %v1174_v62 }
 0x742   : > { %v1180_v50 = vsel %vm1172_vm12, %v1168_v48, %v1176_v13  ;;  %v1179_v51 = vsel %vm1171_vm13, %v1167_v49, %v1175_v21  ;;  %v1182_v5 = vsel %vm319_vm2, %v1178_v1, -1e+09  ;;  %v1551_v13 = vld [vmem:[%s2694_s5] sm:$0xff]  ;;  %v1553_v21 = vld [vmem:[%s2694_s5 + $0x10] sm:$0xff] }
 0x743   : > { %v1184_v52 = vsel %vm319_vm2, %v1180_v50, -1e+09  ;;  %v1183_v53 = vsel %vm319_vm2, %v1179_v51, -1e+09  ;;  %v1186_v7 = vsel %vm565_vm4, %v1182_v5, -inf  ;;  %v1554_v51 = vld [vmem:[%s2694_s5 + $0x18] sm:$0xff] }
 0x744   : > { %v1192_v30 = vsel %vm565_vm4, %v1184_v52, -inf  ;;  %v1189_v54 = vsel %vm565_vm4, %v1183_v53, -inf }
 0x745   : > { %1193 = vmax.xlane.f32.xlu0 %v1192_v30  ;;  %1190 = vmax.xlane.f32.xlu1 %v1189_v54  ;;  %v1557_v54 = vld [vmem:[%s2694_s5 + $0x30] sm:$0xff] }
 0x746   : > { %v2054_v56 = vpack.c.bf16 %v1558_v55, %v1557_v54 }
 0x750   : > { %v1120_v60 = vpop.permute.xlu0 %1119 }
 0x751   : > { %v1169_v61 = vadd.f32 %v1161_v59, %v1120_v60 }
 0x753   : > { %v1177_v63 = vmul.f32 0.2, %v1169_v61  ;;  %vm1173_vm15 = vcmp.gt.f32.partialorder %v1169_v61, 0.0 }
 0x755   : > { %v1181_v0 = vsel %vm1173_vm15, %v1169_v61, %v1177_v63 }
 0x756   : > { %v1185_v2 = vsel %vm319_vm2, %v1181_v0, -1e+09 }
 0x757   : > { %v1195_v4 = vsel %vm565_vm4, %v1185_v2, -inf }
 0x758   : > { %1196 = vmax.xlane.f32.xlu1 %v1195_v4 }
 0x75c   : > { %1187 = vmax.xlane.f32.xlu1 %v1186_v7 }
 0x7d2   : > { %v1191_v8 = vpop.xlane.xlu1 %1190  ;;  %v1194_v17 = vpop.xlane.xlu0 %1193 }
 0x7d3   : > { %v1199_v10 = vsub.f32 %v1183_v53, %v1191_v8  ;;  %v1200_v22 = vsub.f32 %v1184_v52, %v1194_v17  ;;  %v2048_v52 = vpack.c.bf16 %v1554_v51, %v1553_v21  ;;  %v1556_v53 = vld [vmem:[%s2694_s5 + $0x28] sm:$0xff] }
 0x7d5   : > { %v1204_v11 = vmul.f32 1.442695, %v1199_v10  ;;  %v1206_v25 = vmul.f32 1.442695, %v1200_v22 }
 0x7d7   : > { %2139 = vpow2.f32 %v1204_v11 }
 0x7e1   : > { %v2140_v12 = vpop.eup %2139 }
 0x7e2   : > { %v1213_v16 = vsel %vm565_vm4, %v2140_v12, 0.0 }
 0x7e3   : > { %1214 = vadd.xlane.f32.xlu0 %v1213_v16 }
 0x7e5   : > { %v1197_v18 = vpop.xlane.xlu1 %1196 }
 0x7e6   : > { %v1201_v20 = vsub.f32 %v1185_v2, %v1197_v18 }
 0x7e8   : > { %v1208_v23 = vmul.f32 1.442695, %v1201_v20 }
 0x7e9   : > { %v1188_v24 = vpop.xlane.xlu1 %1187 }
 0x7ea   : > { %2141 = vpow2.f32 %v1208_v23  ;;  %v1198_v35 = vsub.f32 %v1182_v5, %v1188_v24 }
 0x7ec   : > { %v1202_v26 = vmul.f32 1.442695, %v1198_v35 }
 0x7ee   : > { %2143 = vpow2.f32 %v1202_v26 }
 0x7ef   : > { %2145 = vpow2.f32 %v1206_v25 }
 0x7f4   : > { %v2142_v27 = vpop.eup %2141 }
 0x7f5   : > { %v1219_v28 = vsel %vm565_vm4, %v2142_v27, 0.0 }
 0x7f6   : > { %1220 = vadd.xlane.f32.xlu0 %v1219_v28 }
 0x7f8   : > { %v2144_v29 = vpop.eup %2143 }
 0x7f9   : > { %v1210_v31 = vsel %vm565_vm4, %v2144_v29, 0.0  ;;  %v2146_v33 = vpop.eup %2145 }
 0x7fa   : > { %1211 = vadd.xlane.f32.xlu1 %v1210_v31  ;;  %v1216_v34 = vsel %vm565_vm4, %v2146_v33, 0.0 }
 0x7fe   : > { %1217 = vadd.xlane.f32.xlu1 %v1216_v34 }
 0x80c   : > { %1231 = vrot.lane.b32.xlu0 %v2516_v32, %s2261_s17 }
 0x80f   : > { %1307 = vrot.lane.b32.xlu1 %v2516_v32, %s2258_s9 }
 0x810   : > { %1537 = vperm.xlu0 %2120, %v320_v37  }
 0x813   : > { %1383 = vrot.lane.b32.xlu1 %v2516_v32, %s2265_s14 }
 0x870   : > { %v1215_v38 = vpop.xlane.xlu0 %1214 }
 0x871   : > { %2147 = vrcp.f32 %v1215_v38 }
 0x87b   : > { %v2148_v9 = vpop.eup %2147 }
 0x87c   : > { %v1225_v40 = vmul.f32 %v2148_v9, %v2140_v12 }
 0x883   : > { %v1221_v39 = vpop.xlane.xlu0 %1220 }
 0x887   : > { %v1212_v41 = vpop.xlane.xlu1 %1211  ;;  %v1232_v42 = vpop.permute.xlu0 %1231 }
 0x888   : > { %1979 = vmatpush3.msra.mxu0 %v1232_v42 }
 0x889   : > { %1981 = vmatmul.mubr.msk.f32.vlgmr.msra.gmra.mrb[6].mxu0 %vm565_vm4, %v1225_v40  ;;  %1983 = vmatprep.subr.mxu0 %v2257_v6 }
 0x88a   : > { %1985 = vmatprep.mubr.msk.f32.mxu0 %vm2256_vm0, %v2257_v6 }
 0x88b   : > { %v1218_v43 = vpop.xlane.xlu1 %1217 }
 0x88c   : > { %2149 = vrcp.f32 %v1218_v43 }
 0x88d   : > { %2151 = vrcp.f32 %v1221_v39 }
 0x88e   : > { %2153 = vrcp.f32 %v1212_v41 }
 0x88f   : > { %v1308_v44 = vpop.permute.xlu1 %1307  ;;  %v1538_v58 = vpop.permute.xlu0 %1537 }
 0x890   : > { %1984 = vmatpush3.msra.mxu0 %v1308_v44 }
 0x891   : > { %1988 = vmatprep.subr.mxu0 %v2257_v6 }
 0x893   : > { %v1384_v46 = vpop.permute.xlu1 %1383 }
 0x896   : > { %v2150_v15 = vpop.eup %2149 }
 0x897   : > { %v1227_v45 = vmul.f32 %v2150_v15, %v2146_v33  ;;  %v2152_v19 = vpop.eup %2151 }
 0x898   : > { %v1229_v47 = vmul.f32 %v2152_v19, %v2142_v27  ;;  %v2154_v48 = vpop.eup %2153 }
 0x899   : > { %1986 = vmatmul.mubr.msk.f32.vlgmr.msra.gmra.mrb[6].mxu0 %vm565_vm4, %v1227_v45  ;;  %v1223_v49 = vmul.f32 %v2154_v48, %v2144_v29 }
 0x89a   : > { %1989 = vmatpush3.msra.mxu0 %v1384_v46  ;;  %1990 = vmatprep.mubr.msk.f32.mxu0 %vm2256_vm0, %v2257_v6 }
 0x89b   : > { %1993 = vmatprep.subr.mxu0 %v2257_v6 }
 0x8a1   : > { %1991 = vmatmul.mubr.msk.f32.vlgmr.msra.gmra.mrb[6].mxu0 %vm565_vm4, %v1229_v47 }
 0x8a2   : > { %1994 = vmatpush3.msra.mxu0 %v2516_v32  ;;  %1995 = vmatprep.mubr.msk.f32.mxu0 %vm2256_vm0, %v2257_v6  ;;  %v1552_v32 = vld [vmem:[%s2694_s5 + $0x8] sm:$0xff] }
 0x8a3   : > { %2017 = vmatprep.subr.mxu0 %v2257_v6  ;;  %v2045_v50 = vpack.c.bf16 %v1552_v32, %v1551_v13 }
 0x8a5   : > { %2046 = vmatpush3.bf16.msra.mxu1 %v2045_v50 }
 0x8a6   : > { %2047 = vmatprep.subr.bf16.mxu1 %v2255_v3 }
 0x8a9   : > { %1996 = vmatmul.mubr.msk.f32.vlgmr.msra.gmra.mrb[6].mxu0 %vm565_vm4, %v1223_v49  ;;  %2049 = vmatpush3.bf16.msra.mxu1 %v2048_v52 }
 0x8aa   : > { %2019 = vmatprep.mubr.msk.f32.mxu0 %vm2256_vm0, %v2257_v6  ;;  %v1555_v6 = vld [vmem:[%s2694_s5 + $0x20] sm:$0xff]  ;;  %2050 = vmatprep.subr.bf16.mxu1 %v2255_v3  ;;  %vm1666_vm0 = vcmask 57344  }
 0x8ab   : > { %v2051_v30 = vpack.c.bf16 %v1556_v53, %v1555_v6 }
 0x8ad   : > { %2052 = vmatpush3.bf16.msra.mxu1 %v2051_v30 }
 0x8ae   : > { %2053 = vmatprep.subr.bf16.mxu1 %v2255_v3 }
 0x8b1   : > { %2055 = vmatpush3.bf16.msra.mxu1 %v2054_v56 }
 0x97c   : > { %v1528_v57 = vpop.f32.mrb[6].mxu0 }
 0x97d   : > { %v1534_v59 = vmul.f32 0.25, %v1528_v57  ;;  %v1997_v60 = vpop.f32.mrb[7].mxu0 }
 0x97f   : > { %v1540_v61 = vmul.f32 %v1538_v58, %v1534_v59 }
 0x981   : > { %v1544_v62 = vrot.slane %v1540_v61, %v2400_v14  ;;  %2018 = vmatpush3.msra.mxu0 %v1540_v61 }
 0x983   : > { %v1545_v63 = vmul.f32 %v1544_v62, %v1538_v58 }
 0x985   : > { %1547 = vrot.lane.b32.xlu1 %v1545_v63, %s2265_s14  ;;  %s2609_s14 = sand.u32 1, %s2245_s25  }
 0x986   : > { %s304_s16 = scalar_lea.vmem [#allocation4], %s2609_s14  ;;  %s1759_s29 = scalar_lea.sflag [#allocation5], %s2609_s14 }
 0x987   : > { %s1784_s23 = sshll.u32 %s304_s16, 4  ;;  %s1785_s23 = int_to_ptr.vmem [resolvable:$true] %s1784_s23 }
 0x988   : > { %s2159_s8 = scalar_lea.vmem %s1785_s23, 16  ;;  %p2166_p0 = scmp.lt.s32.totalorder %s1785_s23, %s2164_s15 }
 0x989   : > { %p2160_p11 = scmp.ne.s32.totalorder %s1785_s23, %s2159_s8  ;;  %p2167_p1 = scmp.lt.s32.totalorder %s2165_s22, %s2159_s8 }
 0x98b   : > { %p2161_p12 = pnand %p2160_p11, %p2349_p5  ;;  %p2168_p2 = por %p2167_p1, %p2166_p0 }
 0x98d   : > { %p2162_p13 = pneg %p2161_p12 }
 0x98f   : > { %p2169_p3 = pnand %p2168_p2, %p2162_p13 }
 0x9f7   : > { %v1548_v0 = vpop.permute.xlu1 %1547 }
 0x9f8   : > { %v1550_v1 = vsel %vm325_vm1, %v1540_v61, %v1548_v0 }
 0x9f9   : > { %2015 = vmatmul.mubr.msk.f32.vlgmr.msra.gmra.mrb[6].mxu1 %vm950_vm10, %v1550_v1 }
 0xacc   : > { %v1628_v2 = vpop.f32.mrb[6].mxu1 }
 0xacd   : > { %1632 = vxpose.xlu1.b32.start.end [1/1] (short) (narrow) %v1628_v2, 8  ;;  %v2016_v3 = vpop.f32.mrb[7].mxu1 }
 0xb4d   : > { %v1648_v4 = vpop.trf.xlu1 }
 0xb4e   : > { %vm1664_vm2 = vcmp.eq.f32.partialorder %v1648_v4, 0.0 }
 0xb4f   : > { %v1665_v5 = vsel %vm1664_vm2, -1e+20, %v1648_v4 }
 0xb50   : > { %v1667_v7 = vsel %vm1666_vm0, %v1665_v5, -inf }
 0xb51   : > { %1668 = vmax.xlane.f32.xlu0 %v1667_v7 }
 0xbde   : > { %v1669_v14 = vpop.xlane.xlu0 %1668 }
 0xbdf   : > { %v1670_v8 = vsub.f32 %v1665_v5, %v1669_v14 }
 0xbe1   : > { %v1671_v10 = vmul.f32 1.442695, %v1670_v8 }
 0xbe3   : > { %2155 = vpow2.f32 %v1671_v10 }
 0xbed   : > { %v2156_v11 = vpop.eup %2155 }
 0xbee   : > { %v1673_v12 = vsel %vm1666_vm0, %v2156_v11, 0.0 }
 0xbef   : > { %1674 = vadd.xlane.f32.xlu0 %v1673_v12 }
 0xc7c   : > { %v1675_v16 = vpop.xlane.xlu0 %1674 }
 0xc7d   : > { %2157 = vrcp.f32 %v1675_v16 }
 0xc87   : > { %v2158_v17 = vpop.eup %2157 }
 0xc88   : > { %v1677_v18 = vmul.f32 %v2158_v17, %v2156_v11 }
 0xc8a   : > { %2020 = vmatmul.mubr.msk.f32.vlgmr.msra.gmra.mrb[8].mxu0 %vm565_vm4, %v1677_v18  ;;  %1753 = vst.msk [vmem:[%s304_s16] sm:$0x1] %vm1666_vm0, %v1677_v18 }
 0xc8b   : > { %2172 = shalt.err (!%p2169_p3)
}
 0xc8c   : > { %s2173_s9 = scalar_lea.hbm %s2620_s21, 16  ;;  %s2177_s19 = scalar_lea.hbm %s2696_s7, 32 }
 0xc8d   : > { %p2174_p4 = scmp.ne.s32.totalorder %s2620_s21, %s2173_s9  ;;  %p2178_p9 = scmp.lt.u32.totalorder %s2620_s21, %s2696_s7 }
 0xc8e   : > { %p2179_p10 = scmp.lt.u32.totalorder %s2177_s19, %s2173_s9  ;;  %p2181_p12 = scmp.lt.u32.totalorder %s2173_s9, %s2620_s21 }
 0xc8f   : > { %p2175_p7 = pnand %p2174_p4, %p2349_p5 }
 0xc90   : > { %p2180_p11 = por %p2179_p10, %p2178_p9 }
 0xc91   : > { %p2176_p8 = pneg %p2175_p7 }
 0xc92   : > { %p2182_p13 = por %p2181_p12, %p2180_p11 }
 0xc94   : > { %p2183_p0 = pnand %p2182_p13, %p2176_p8 }
 0xc96   : > { %2186 = shalt.err (!%p2183_p0)
}
 0xc97   : > { %2063 = dma.vmem_to_hbm [thread:$0]  (%p2349_p5), %s1785_s23, 16, %s2620_s21, %s1759_s29   ;;  %vm1751_vm1 = vcmask 253952  }
 0xc98   : > { %s298_s8 = scalar_lea.vmem [#allocation2], %s2609_s14  ;;  %s2646_s16 = scalar_lea.hbm %s2695_s6, %s1911_s18 }
 0xc99   : > { %s1771_s15 = sshll.u32 %s298_s8, 4  ;;  %s1755_s9 = scalar_lea.sflag [#allocation3], %s2609_s14  ;;  %s2648_s15 = int_to_ptr.vmem [resolvable:$true] %s1771_s15 }
 0xc9a   : > { %s2187_s19 = scalar_lea.vmem %s2648_s15, 16  ;;  %s2270_s28 = smov [#allocation2]  }
 0xc9b   : > { %p2188_p1 = scmp.ne.s32.totalorder %s2648_s15, %s2187_s19  ;;  %s2191_s21 = sshll.u32 %s2270_s28, 4  ;;  %s2192_s21 = int_to_ptr.vmem [resolvable:$false] %s2191_s21 }
 0xc9c   : > { %s2193_s23 = scalar_lea.vmem %s2192_s21, 32  ;;  %p2194_p4 = scmp.lt.s32.totalorder %s2648_s15, %s2192_s21 }
 0xc9d   : > { %p2189_p2 = pnand %p2188_p1, %p2349_p5  ;;  %p2195_p7 = scmp.lt.s32.totalorder %s2193_s23, %s2187_s19 }
 0xc9f   : > { %p2190_p3 = pneg %p2189_p2  ;;  %p2196_p8 = por %p2195_p7, %p2194_p4 }
 0xca1   : > { %p2197_p9 = pnand %p2196_p8, %p2190_p3 }
 0xd5d   : > { %v1747_v20 = vpop.f32.mrb[8].mxu0 }
 0xd5e   : > { %1752 = vst.msk [vmem:[%s298_s8] sm:$0x1] %vm1751_vm1, %v1747_v20  ;;  %v2021_v22 = vpop.f32.mrb[9].mxu0 }
 0xd5f   : > { %2200 = shalt.err (!%p2197_p9)
}
 0xd60   : > { %s2201_s14 = scalar_lea.hbm %s2646_s16, 16  ;;  %s2205_s20 = scalar_lea.hbm %s2695_s6, 32 }
 0xd61   : > { %p2202_p10 = scmp.ne.s32.totalorder %s2646_s16, %s2201_s14  ;;  %p2206_p13 = scmp.lt.u32.totalorder %s2646_s16, %s2695_s6 }
 0xd62   : > { %p2207_p0 = scmp.lt.u32.totalorder %s2205_s20, %s2201_s14  ;;  %p2209_p2 = scmp.lt.u32.totalorder %s2201_s14, %s2646_s16 }
 0xd63   : > { %p2203_p11 = pnand %p2202_p10, %p2349_p5 }
 0xd64   : > { %p2208_p1 = por %p2207_p0, %p2206_p13 }
 0xd65   : > { %p2204_p12 = pneg %p2203_p11 }
 0xd66   : > { %p2210_p3 = por %p2209_p2, %p2208_p1 }
 0xd68   : > { %p2211_p4 = pnand %p2210_p3, %p2204_p12 }
 0xd6a   : > { %2214 = shalt.err (!%p2211_p4)
}
 0xd6b   : > { %2062 = dma.vmem_to_hbm [thread:$0]  (%p2349_p5), %s2648_s15, 16, %s2646_s16, %s1755_s9  }
 0xd6c PF: > { %p2073_p7 = scmp.ge.s32.totalorder %s2253_s27, 2  ;;  %s1796_s22 = sand.u32 1, %s2241_s24  }
 0xd6d   : > { %s1797_s17 = scalar_lea.sflag [#allocation3], %s1796_s22 }
 0xd6e   : > { %p2067_p8 = pnand %p2073_p7, %p2353_p6 }
 0xd70   : > { %2232 = dma.done.wait (!%p2067_p8), %s1797_s17, 16  }
 0xd71   : > { %2234 = vsyncadd (!%p2067_p8), %s1797_s17, 4294967280  ;;  %s1805_s19 = scalar_lea.sflag [#allocation5], %s1796_s22 }
 0xd72   : > { %2236 = dma.done.wait (!%p2067_p8), %s1805_s19, 16  }
 0xd73   : > { %2238 = vsyncadd (!%p2067_p8), %s1805_s19, 4294967280  ;;  %p21_p5 = scmp.ge.s32.totalorder %s2336_s30, 4   ;;  %s2699_s24 = smov %s2245_s25 }
 0xd74   : > { %s2700_s25 = smov %s2249_s26  ;;  %s2701_s26 = smov %s2347_s10 }
 0xd75   : > { %s2702_s27 = smov %s2336_s30  ;;  %23 = sbr.rel (!%p21_p5) target bundleno = 5 (0x5), region = 102 }
 0xd7c   :  { %1809 = vsyncpa [#allocation3], 1 }
 0xd7d   :  { %1811 = vsyncpa [#allocation3 + $0x1], 1 }
 0xd7e   :  { %1812 = vsyncpa [#allocation5], 1 }
 0xd7f   :  { %1814 = vsyncpa [#allocation5 + $0x1], 1 }

</bundles_post_ra>
